<compile_context>
chip_gen: v6e
topology: v6e:2x2x1
jax: 0.10.0
libtpu: 0.0.40
codegen_flags: <defaults>
</compile_context>

<pallas_src>
import jax
import jax.numpy as jnp
from jax.experimental import pallas as pl
from jax.experimental.pallas import tpu as pltpu

TEXT_DIM = 300
IMAGE_DIM = 512
EMBEDDING_DIM = 128
MAX_TM = 512          # batch tile for large B (multiple of 8, ~4-5 MB double-buffered)


def _cotrain_kernel(text_ref, tw_ref, tb_ref, image_ref, iw_ref, ib_ref,
                    text_out_ref, image_out_ref):
    """Both linear heads for one batch tile (weights resident across the grid)."""
    t = text_ref[...].astype(jnp.bfloat16)
    t_acc = jnp.dot(t, tw_ref[...], preferred_element_type=jnp.float32)
    text_out_ref[...] = (t_acc + tb_ref[...]).astype(text_out_ref.dtype)

    im = image_ref[...].astype(jnp.bfloat16)
    i_acc = jnp.dot(im, iw_ref[...], preferred_element_type=jnp.float32)
    image_out_ref[...] = (i_acc + ib_ref[...]).astype(image_out_ref.dtype)


def co_trained_embedding(text, image, params):
    """Fused forward: (text_embed, image_embed) = (text@Wt+bt, image@Wi+bi).

    text : (B, TEXT_DIM) f32, image : (B, IMAGE_DIM) f32
    params: (text_w[(TEXT_DIM, E)] bf16, text_b[(1, E)] f32,
             image_w[(IMAGE_DIM, E)] bf16, image_b[(1, E)] f32)
    """
    text_w, text_b, image_w, image_b = params
    B = text.shape[0]

    # Small B: one full-extent M block (single grid step, one launch).
    # Large B: tile M so VMEM use is bounded; weights stay resident across tiles.
    tm = B if B <= MAX_TM else MAX_TM
    grid = (pl.cdiv(B, tm),)

    flops = 2 * B * EMBEDDING_DIM * (TEXT_DIM + IMAGE_DIM)
    bytes_accessed = (4 * (text.size + image.size + text_b.size + image_b.size
                           + 2 * B * EMBEDDING_DIM)
                      + 2 * (text_w.size + image_w.size))

    in_specs = [
        pl.BlockSpec((tm, TEXT_DIM), lambda i: (i, 0)),          # text tile
        pl.BlockSpec((TEXT_DIM, EMBEDDING_DIM), lambda i: (0, 0)),   # Wt (resident)
        pl.BlockSpec((1, EMBEDDING_DIM), lambda i: (0, 0)),          # bt (resident)
        pl.BlockSpec((tm, IMAGE_DIM), lambda i: (i, 0)),         # image tile
        pl.BlockSpec((IMAGE_DIM, EMBEDDING_DIM), lambda i: (0, 0)),  # Wi (resident)
        pl.BlockSpec((1, EMBEDDING_DIM), lambda i: (0, 0)),          # bi (resident)
    ]
    out_specs = (
        pl.BlockSpec((tm, EMBEDDING_DIM), lambda i: (i, 0)),
        pl.BlockSpec((tm, EMBEDDING_DIM), lambda i: (i, 0)),
    )

    text_out, image_out = pl.pallas_call(
        _cotrain_kernel,
        out_shape=(
            jax.ShapeDtypeStruct((B, EMBEDDING_DIM), text.dtype),
            jax.ShapeDtypeStruct((B, EMBEDDING_DIM), image.dtype),
        ),
        grid=grid,
        in_specs=in_specs,
        out_specs=out_specs,
        compiler_params=pltpu.CompilerParams(
            dimension_semantics=("parallel",)),
        cost_estimate=pl.CostEstimate(
            flops=flops, transcendentals=0, bytes_accessed=bytes_accessed),
    )(text, text_w, text_b, image, image_w, image_b)
    return text_out, image_out


def init_linear_params(key, in_features, out_features):
    """PyTorch nn.Linear default init (U(-1/sqrt(in), 1/sqrt(in))).

    Weight stored as (in, out) == W^T in bf16 (streamed dtype), bias (1, out) f32.
    """
    kw, kb = jax.random.split(key)
    bound = 1.0 / jnp.sqrt(jnp.float32(in_features))
    w = jax.random.uniform(
        kw, (in_features, out_features), jnp.float32, -bound, bound
    ).astype(jnp.bfloat16)
    b = jax.random.uniform(kb, (1, out_features), jnp.float32, -bound, bound)
    return w, b


if __name__ == "__main__":
    key = jax.random.PRNGKey(0)
    k_text_p, k_image_p, k_text_x, k_image_x = jax.random.split(key, 4)

    batch = 8
    text_w, text_b = init_linear_params(k_text_p, TEXT_DIM, EMBEDDING_DIM)
    image_w, image_b = init_linear_params(k_image_p, IMAGE_DIM, EMBEDDING_DIM)
    params = (text_w, text_b, image_w, image_b)

    text = jax.random.normal(k_text_x, (batch, TEXT_DIM), jnp.float32)
    image = jax.random.normal(k_image_x, (batch, IMAGE_DIM), jnp.float32)

    text_embed, image_embed = jax.jit(co_trained_embedding)(text, image, params)
    jax.block_until_ready((text_embed, image_embed))

    # Correctness check against a plain-JAX reference with the same bf16 operand
    # rounding (the kernel feeds bf16 to the MXU and accumulates in f32).
    ref_text = (text.astype(jnp.bfloat16).astype(jnp.float32)
                @ text_w.astype(jnp.float32) + text_b)
    ref_image = (image.astype(jnp.bfloat16).astype(jnp.float32)
                 @ image_w.astype(jnp.float32) + image_b)
    assert text_embed.shape == (batch, EMBEDDING_DIM)
    assert image_embed.shape == (batch, EMBEDDING_DIM)
    assert jnp.allclose(text_embed, ref_text, atol=1e-4, rtol=1e-4)
    assert jnp.allclose(image_embed, ref_image, atol=1e-4, rtol=1e-4)

    print("KERNEL_OK")
</pallas_src>

<mosaic_0001>
module attributes {stable_mosaic.version = 11 : i64} {
  func.func @_cotrain_kernel(%arg0: i32, %arg1: memref<8x300xf32, #tpu.memory_space<vmem>>, %arg2: memref<300x128xbf16, #tpu.memory_space<vmem>>, %arg3: memref<1x128xf32, #tpu.memory_space<vmem>>, %arg4: memref<8x512xf32, #tpu.memory_space<vmem>>, %arg5: memref<512x128xbf16, #tpu.memory_space<vmem>>, %arg6: memref<1x128xf32, #tpu.memory_space<vmem>>, %arg7: memref<8x128xf32, #tpu.memory_space<vmem>>, %arg8: memref<8x128xf32, #tpu.memory_space<vmem>>) attributes {dimension_semantics = [#tpu.dimension_semantics<parallel>], iteration_bounds = array<i64: 1>, scalar_prefetch = 0 : i64, scratch_operands = 0 : i64, tpu.core_type = #tpu.core_type<tc>, window_params = [{transform_indices = @transform_0, window_bounds = array<i64: 8, 300>}, {pipeline_mode = #tpu.pipeline_mode<synchronous>, transform_indices = @transform_1, window_bounds = array<i64: 300, 128>}, {pipeline_mode = #tpu.pipeline_mode<synchronous>, transform_indices = @transform_2, window_bounds = array<i64: 1, 128>}, {transform_indices = @transform_3, window_bounds = array<i64: 8, 512>}, {pipeline_mode = #tpu.pipeline_mode<synchronous>, transform_indices = @transform_4, window_bounds = array<i64: 512, 128>}, {pipeline_mode = #tpu.pipeline_mode<synchronous>, transform_indices = @transform_5, window_bounds = array<i64: 1, 128>}, {transform_indices = @transform_6, window_bounds = array<i64: 8, 128>}, {transform_indices = @transform_7, window_bounds = array<i64: 8, 128>}]} {
    %c0 = arith.constant 0 : index
    %c0_0 = arith.constant 0 : index
    %0 = vector.load %arg1[%c0, %c0_0] : memref<8x300xf32, #tpu.memory_space<vmem>>, vector<8x300xf32>
    %1 = arith.truncf %0 : vector<8x300xf32> to vector<8x300xbf16>
    %c0_1 = arith.constant 0 : index
    %c0_2 = arith.constant 0 : index
    %2 = vector.load %arg2[%c0_1, %c0_2] : memref<300x128xbf16, #tpu.memory_space<vmem>>, vector<300x128xbf16>
    %cst = arith.constant dense<0.000000e+00> : vector<8x128xf32>
    %3 = tpu.matmul %1, %2, %cst {dimension_numbers = #tpu.dot_dimension_numbers<[1], [0], [0], [1], [0, 0, 1, 1], [], []>} : vector<8x300xbf16>, vector<300x128xbf16>, vector<8x128xf32> -> vector<8x128xf32>
    %c0_3 = arith.constant 0 : index
    %c0_4 = arith.constant 0 : index
    %4 = vector.load %arg3[%c0_3, %c0_4] : memref<1x128xf32, #tpu.memory_space<vmem>>, vector<1x128xf32>
    %5 = vector.broadcast %4 : vector<1x128xf32> to vector<8x128xf32>
    %6 = arith.addf %3, %5 : vector<8x128xf32>
    %c0_5 = arith.constant 0 : index
    %c0_6 = arith.constant 0 : index
    %7 = vector.load %arg7[%c0_5, %c0_6] : memref<8x128xf32, #tpu.memory_space<vmem>>, vector<8x128xf32>
    tpu.vector_store %arg7[%c0_5, %c0_6], %6 {strides = array<i32>} : memref<8x128xf32, #tpu.memory_space<vmem>>, vector<8x128xf32>,
    %c0_7 = arith.constant 0 : index
    %c0_8 = arith.constant 0 : index
    %8 = vector.load %arg4[%c0_7, %c0_8] : memref<8x512xf32, #tpu.memory_space<vmem>>, vector<8x512xf32>
    %9 = arith.truncf %8 : vector<8x512xf32> to vector<8x512xbf16>
    %c0_9 = arith.constant 0 : index
    %c0_10 = arith.constant 0 : index
    %10 = vector.load %arg5[%c0_9, %c0_10] : memref<512x128xbf16, #tpu.memory_space<vmem>>, vector<512x128xbf16>
    %cst_11 = arith.constant dense<0.000000e+00> : vector<8x128xf32>
    %11 = tpu.matmul %9, %10, %cst_11 {dimension_numbers = #tpu.dot_dimension_numbers<[1], [0], [0], [1], [0, 0, 1, 1], [], []>} : vector<8x512xbf16>, vector<512x128xbf16>, vector<8x128xf32> -> vector<8x128xf32>
    %c0_12 = arith.constant 0 : index
    %c0_13 = arith.constant 0 : index
    %12 = vector.load %arg6[%c0_12, %c0_13] : memref<1x128xf32, #tpu.memory_space<vmem>>, vector<1x128xf32>
    %13 = vector.broadcast %12 : vector<1x128xf32> to vector<8x128xf32>
    %14 = arith.addf %11, %13 : vector<8x128xf32>
    %c0_14 = arith.constant 0 : index
    %c0_15 = arith.constant 0 : index
    %15 = vector.load %arg8[%c0_14, %c0_15] : memref<8x128xf32, #tpu.memory_space<vmem>>, vector<8x128xf32>
    tpu.vector_store %arg8[%c0_14, %c0_15], %14 {strides = array<i32>} : memref<8x128xf32, #tpu.memory_space<vmem>>, vector<8x128xf32>,
    return
  }
  func.func @transform_0(%arg0: i32) -> (i32, i32) {
    %c0_i32 = arith.constant 0 : i32
    %c0_i32_0 = arith.constant 0 : i32
    return %arg0, %c0_i32 : i32, i32
  }
  func.func @transform_1(%arg0: i32) -> (i32, i32) {
    %c0_i32 = arith.constant 0 : i32
    %c0_i32_0 = arith.constant 0 : i32
    %c0_i32_1 = arith.constant 0 : i32
    return %c0_i32, %c0_i32_0 : i32, i32
  }
  func.func @transform_2(%arg0: i32) -> (i32, i32) {
    %c0_i32 = arith.constant 0 : i32
    %c0_i32_0 = arith.constant 0 : i32
    %c0_i32_1 = arith.constant 0 : i32
    return %c0_i32, %c0_i32_0 : i32, i32
  }
  func.func @transform_3(%arg0: i32) -> (i32, i32) {
    %c0_i32 = arith.constant 0 : i32
    %c0_i32_0 = arith.constant 0 : i32
    return %arg0, %c0_i32 : i32, i32
  }
  func.func @transform_4(%arg0: i32) -> (i32, i32) {
    %c0_i32 = arith.constant 0 : i32
    %c0_i32_0 = arith.constant 0 : i32
    %c0_i32_1 = arith.constant 0 : i32
    return %c0_i32, %c0_i32_0 : i32, i32
  }
  func.func @transform_5(%arg0: i32) -> (i32, i32) {
    %c0_i32 = arith.constant 0 : i32
    %c0_i32_0 = arith.constant 0 : i32
    %c0_i32_1 = arith.constant 0 : i32
    return %c0_i32, %c0_i32_0 : i32, i32
  }
  func.func @transform_6(%arg0: i32) -> (i32, i32) {
    %c0_i32 = arith.constant 0 : i32
    %c0_i32_0 = arith.constant 0 : i32
    return %arg0, %c0_i32 : i32, i32
  }
  func.func @transform_7(%arg0: i32) -> (i32, i32) {
    %c0_i32 = arith.constant 0 : i32
    %c0_i32_0 = arith.constant 0 : i32
    return %arg0, %c0_i32 : i32, i32
  }
}

</mosaic_0001>

<bundles_post_ra>
// kernel: co_trained_embedding.1
= control target key start
LH: loop header
LB: loop body
LE: loop exit
PB: predicated region body
PF: predicated region fallthrough
CT: control target
= control target key end

     0   :  { %13 = vsyncpa [#allocation3], 0  ;;  %s1120_s0 = inlined_call_operand.hbm [shape: f32[8,300], index: 0, kind: input, shape index: {}]   ;;  %s1121_s1 = inlined_call_operand.hbm [shape: bf16[300,128], index: 1, kind: input, shape index: {}]   ;;  %s1122_s2 = inlined_call_operand.vmem [shape: f32[1,128], index: 2, kind: input, shape index: {}]   ;;  %s1123_s3 = inlined_call_operand.hbm [shape: f32[8,512], index: 3, kind: input, shape index: {}]   ;;  %s1124_s4 = inlined_call_operand.hbm [shape: bf16[512,128], index: 4, kind: input, shape index: {}]   ;;  %s1125_s5 = inlined_call_operand.vmem [shape: f32[1,128], index: 5, kind: input, shape index: {}]   ;;  %s1126_s6 = inlined_call_operand.hbm [shape: f32[8,128], index: 6, kind: output, shape index: {0}]   ;;  %s1127_s7 = inlined_call_operand.hbm [shape: f32[8,128], index: 7, kind: output, shape index: {1}]  }
   0x1   :  { %14 = vsyncpa [#allocation6], 0 }
   0x2   :  { %15 = vsyncpa [#allocation9], 0 }
   0x3   :  { %16 = vsyncpa [#allocation4], 0 }
   0x4   :  { %17 = vsyncpa [#allocation12], 0  ;;  %s1040_s24 = smov [#allocation5]  }
   0x5   :  { %s33_s25 = sshll.u32 %s1040_s24, 4  ;;  %s34_s25 = int_to_ptr.vmem [resolvable:$true] %s33_s25 }
   0x6   :  { %s918_s26 = scalar_lea.vmem %s34_s25, 2432  ;;  %p923_p1 = scmp.lt.s32.totalorder %s34_s25, %s34_s25 }
   0x7   :  { %p919_p0 = scmp.ne.s32.totalorder %s34_s25, %s918_s26  ;;  %p924_p2 = scmp.lt.s32.totalorder %s918_s26, %s918_s26 }
   0x9   :  { %p925_p3 = por %p924_p2, %p923_p1 }
   0xb   :  { %p926_p4 = pnand %p925_p3, %p919_p0 }
   0xd   :  { %929 = shalt.err (!%p926_p4)
}
   0xe   :  { %s1041_s27 = smov 64   ;;  %s1042_s28 = smov 4  }
   0xf   :  { %39 = dma.hbm_to_vmem [thread:$0]  %s1121_s1, 2432, %s34_s25, [#allocation6], %s1041_s27, %s1041_s27, %s1042_s28  }
  0x10   :  { %s1043_s8 = smov [#allocation2]   ;;  %s1044_s10 = smov [#allocation7]  }
  0x11   :  { %s24_s9 = sshll.u32 %s1043_s8, 4  ;;  %s48_s11 = sshll.u32 %s1044_s10, 4  ;;  %s25_s9 = int_to_ptr.vmem [resolvable:$true] %s24_s9  ;;  %s49_s11 = int_to_ptr.vmem [resolvable:$true] %s48_s11 }
  0x12   :  { %s938_s12 = scalar_lea.vmem %s25_s9, 384  ;;  %p943_p6 = scmp.lt.s32.totalorder %s25_s9, %s25_s9 }
  0x13   :  { %p939_p5 = scmp.ne.s32.totalorder %s25_s9, %s938_s12  ;;  %p944_p7 = scmp.lt.s32.totalorder %s938_s12, %s938_s12 }
  0x15   :  { %p945_p8 = por %p944_p7, %p943_p6 }
  0x17   :  { %p946_p9 = pnand %p945_p8, %p939_p5 }
  0x19   :  { %949 = shalt.err (!%p946_p9)
}
  0x1a   :  { %27 = dma.hbm_to_vmem [thread:$0]  %s1120_s0, 384, %s25_s9, [#allocation3]  }
  0x1b   :  { %s958_s15 = scalar_lea.vmem %s49_s11, 512  ;;  %p963_p11 = scmp.lt.s32.totalorder %s49_s11, %s49_s11 }
  0x1c   :  { %p959_p10 = scmp.ne.s32.totalorder %s49_s11, %s958_s15  ;;  %p964_p12 = scmp.lt.s32.totalorder %s958_s15, %s958_s15 }
  0x1e   :  { %p965_p13 = por %p964_p12, %p963_p11 }
  0x20   :  { %p966_p0 = pnand %p965_p13, %p959_p10 }
  0x22   :  { %969 = shalt.err (!%p966_p0)
}
  0x23   :  { %51 = dma.hbm_to_vmem [thread:$0]  %s1123_s3, 512, %s49_s11, [#allocation6]  }
  0x24   :  { %s1045_s17 = smov [#allocation8]  }
  0x25   :  { %s57_s18 = sshll.u32 %s1045_s17, 4  ;;  %s58_s18 = int_to_ptr.vmem [resolvable:$true] %s57_s18 }
  0x26   :  { %s978_s19 = scalar_lea.vmem %s58_s18, 4096  ;;  %p983_p2 = scmp.lt.s32.totalorder %s58_s18, %s58_s18 }
  0x27   :  { %p979_p1 = scmp.ne.s32.totalorder %s58_s18, %s978_s19  ;;  %p984_p3 = scmp.lt.s32.totalorder %s978_s19, %s978_s19 }
  0x29   :  { %p985_p4 = por %p984_p3, %p983_p2 }
  0x2b   :  { %p986_p5 = pnand %p985_p4, %p979_p1 }
  0x2d   :  { %989 = shalt.err (!%p986_p5)
}
  0x2e   :  { %63 = dma.hbm_to_vmem [thread:$0]  %s1124_s4, 4096, %s58_s18, [#allocation9], %s1041_s27, %s1041_s27, %s1042_s28  }
  0x2f   :  { %1030 = dma.done.wait [#allocation3], 384  }
  0x30   :  { %1031 = vsyncadd [#allocation3], 4294966912 }
  0x31   :  { %1032 = dma.done.wait [#allocation6], 2944  }
  0x32   :  { %1033 = vsyncadd [#allocation6], 4294964352 }
  0x33   :  { %1034 = dma.done.wait [#allocation9], 4096  }
  0x34   :  { %1035 = vsyncadd [#allocation9], 4294963200  ;;  %v1046_v0 = vmov 0.0   ;;  %vm1047_vm0 = vmmov 0   ;;  %v859_v1 = vld [vmem:[#allocation5 + $0x78] sm:$0xff]   ;;  %v861_v3 = vld [vmem:[#allocation5 + $0x70] sm:$0xff]  }
  0x35   :  { %839 = vmatprep.subr.bf16.mxu1 %v1046_v0  ;;  %845 = vmatprep.mubr.msk.bf16.mxu1 %vm1047_vm0, %v1046_v0  ;;  %v860_v2 = vld [vmem:[#allocation5 + $0x38] sm:$0xff]   ;;  %v862_v4 = vld [vmem:[#allocation5 + $0x30] sm:$0xff]   ;;  %v863_v5 = vld [vmem:[#allocation5 + $0x68] sm:$0xff]   ;;  %vm247_vm1 = vcmask 1045504   ;;  %vm243_vm2 = vcmask 359424   ;;  %s1048_s21 = smov [#allocation10]  }
  0x36   :  { %769 = vmatprep.subr.bf16.mxu0 %v859_v1  ;;  %v864_v6 = vld [vmem:[#allocation5 + $0x28] sm:$0xff]   ;;  %v865_v7 = vld [vmem:[#allocation5 + $0x60] sm:$0xff]   ;;  %v867_v8 = vld [vmem:[#allocation5 + $0x90] sm:$0x3f]   ;;  %s690_s22 = sshll.u32 %s1048_s21, 4  ;;  %s691_s22 = int_to_ptr.vmem [resolvable:$true] %s690_s22 }
  0x37   :  { %770 = vmatpush3.bf16.msra.mxu0 %v860_v2  ;;  %v866_v9 = vld [vmem:[#allocation5 + $0x20] sm:$0xff]   ;;  %v249_v10 = vsel %vm247_vm1, %v867_v8, 0  ;;  %v870_v11 = vld [vmem:[#allocation5 + $0x88] sm:$0xff]   ;;  %v868_v12 = vld [vmem:[#allocation5 + $0x58] sm:$0xff]   ;;  %s990_s23 = scalar_lea.vmem %s691_s22, 128  ;;  %p995_p7 = scmp.lt.s32.totalorder %s691_s22, %s691_s22 }
  0x38   :  { %771 = vmatprep.subr.bf16.mxu0 %v861_v3  ;;  %840 = vmatpush3.bf16.msra.mxu1 %v249_v10  ;;  %v869_v13 = vld [vmem:[#allocation5 + $0x18] sm:$0xff]   ;;  %v871_v14 = vld [vmem:[#allocation5 + $0x50] sm:$0xff]   ;;  %v873_v15 = vld [vmem:[#allocation5 + $0x80] sm:$0xff]   ;;  %p991_p6 = scmp.ne.s32.totalorder %s691_s22, %s990_s23  ;;  %p996_p8 = scmp.lt.s32.totalorder %s990_s23, %s990_s23 }
  0x39   :  { %841 = vmatprep.subr.bf16.mxu1 %v1046_v0  ;;  %v875_v16 = vld [vmem:[#allocation8 + $0x78] sm:$0xff]   ;;  %v81_v18 = vld [vmem:[#allocation2 + $0x10] sm:$0xff]  ;;  %v874_v21 = vld [vmem:[#allocation5 + $0x48] sm:$0xff]  }
  0x3a   :  { %v872_v17 = vld [vmem:[#allocation5 + $0x10] sm:$0xff]   ;;  %v84_v19 = vpack.c.bf16 %v81_v18, %v81_v18  ;;  %v879_v22 = vld [vmem:[#allocation8 + $0x70] sm:$0xff]   ;;  %v878_v24 = vld [vmem:[#allocation5 + $0x40] sm:$0xff]   ;;  %p997_p9 = por %p996_p8, %p995_p7 }
  0x3b   :  { %772 = vmatpush3.bf16.msra.mxu0 %v862_v4  ;;  %v877_v20 = vld [vmem:[#allocation8 + $0x38] sm:$0xff]   ;;  %v876_v23 = vld [vmem:[#allocation5 + $0x8] sm:$0xff]   ;;  %v882_v28 = vld [vmem:[#allocation8 + $0x68] sm:$0xff]  }
  0x3c   :  { %773 = vmatprep.subr.bf16.mxu0 %v863_v5  ;;  %842 = vmatpush3.bf16.msra.mxu1 %v870_v11  ;;  %v881_v25 = vld [vmem:[#allocation8 + $0x30] sm:$0xff]   ;;  %v80_v26 = vld [vmem:[#allocation2 + $0x8] sm:$0xff]  ;;  %v880_v29 = vld [vmem:[#allocation5] sm:$0xff]   ;;  %p998_p10 = pnand %p997_p9, %p991_p6 }
  0x3d   :  { %843 = vmatprep.subr.bf16.mxu1 %v1046_v0  ;;  %v83_v27 = vpack.c.bf16 %v80_v26, %v80_v26  ;;  %v79_v30 = vld [vmem:[#allocation2] sm:$0xff]  ;;  %v883_v31 = vld [vmem:[#allocation8 + $0xf8] sm:$0xff]   ;;  %v884_v32 = vld [vmem:[#allocation8 + $0x28] sm:$0xff]  }
  0x3e   :  { %v886_v33 = vld [vmem:[#allocation8 + $0x60] sm:$0xff]   ;;  %v885_v34 = vld [vmem:[#allocation8 + $0xb8] sm:$0xff]   ;;  %v82_v35 = vpack.c.bf16 %v79_v30, %v79_v30  ;;  %v887_v36 = vld [vmem:[#allocation8 + $0xf0] sm:$0xff]  }
  0x3f   :  { %774 = vmatpush3.bf16.msra.mxu0 %v864_v6  ;;  %283 = vmatprep.mubr.bf16.mxu0 %v83_v27  ;;  %v888_v37 = vld [vmem:[#allocation8 + $0x20] sm:$0xff]   ;;  %v890_v38 = vld [vmem:[#allocation8 + $0x58] sm:$0xff]   ;;  %v889_v39 = vld [vmem:[#allocation8 + $0xb0] sm:$0xff]  }
  0x40   :  { %775 = vmatprep.subr.bf16.mxu0 %v865_v7  ;;  %844 = vmatpush3.bf16.msra.mxu1 %v873_v15  ;;  %v891_v40 = vld [vmem:[#allocation8 + $0xe8] sm:$0xff]   ;;  %v892_v41 = vld [vmem:[#allocation8 + $0x18] sm:$0xff]   ;;  %v894_v42 = vld [vmem:[#allocation8 + $0x50] sm:$0xff]  }
  0x41   :  { %795 = vmatprep.subr.bf16.mxu1 %v875_v16  ;;  %v893_v43 = vld [vmem:[#allocation8 + $0xa8] sm:$0xff]   ;;  %v895_v44 = vld [vmem:[#allocation8 + $0xe0] sm:$0xff]   ;;  %v896_v45 = vld [vmem:[#allocation8 + $0x10] sm:$0xff]  }
  0x42   :  { %v898_v46 = vld [vmem:[#allocation8 + $0x48] sm:$0xff]   ;;  %v897_v47 = vld [vmem:[#allocation8 + $0xa0] sm:$0xff]   ;;  %v899_v48 = vld [vmem:[#allocation8 + $0xd8] sm:$0xff]  }
  0x43   :  { %776 = vmatpush3.bf16.msra.mxu0 %v866_v9  ;;  %846 = vmatmul.mubr.msk.bf16.vlgmr.msra.gmra.mxu1 %vm243_vm2, %v84_v19  ;;  %v900_v49 = vld [vmem:[#allocation8 + $0x8] sm:$0xff]   ;;  %v902_v50 = vld [vmem:[#allocation8 + $0x40] sm:$0xff]   ;;  %v901_v51 = vld [vmem:[#allocation8 + $0x98] sm:$0xff]  }
  0x44   :  { %777 = vmatprep.subr.bf16.mxu0 %v868_v12  ;;  %796 = vmatpush3.bf16.msra.mxu1 %v877_v20  ;;  %v903_v52 = vld [vmem:[#allocation8 + $0xd0] sm:$0xff]   ;;  %v904_v53 = vld [vmem:[#allocation8] sm:$0xff]   ;;  %v333_v54 = vld [vmem:[#allocation7 + $0x8] sm:$0xff] }
  0x45   :  { %797 = vmatprep.subr.bf16.mxu1 %v879_v22  ;;  %v332_v55 = vld [vmem:[#allocation7] sm:$0xff]  ;;  %v337_v56 = vpack.c.bf16 %v333_v54, %v333_v54  ;;  %v905_v58 = vld [vmem:[#allocation8 + $0x90] sm:$0xff]   ;;  %v906_v59 = vld [vmem:[#allocation8 + $0xc8] sm:$0xff]  }
  0x46   :  { %v336_v57 = vpack.c.bf16 %v332_v55, %v332_v55  ;;  %v335_v60 = vld [vmem:[#allocation7 + $0x18] sm:$0xff]  ;;  %v907_v62 = vld [vmem:[#allocation8 + $0x88] sm:$0xff]   ;;  %v908_v63 = vld [vmem:[#allocation8 + $0xc0] sm:$0xff]  }
  0x47   :  { %778 = vmatpush3.bf16.msra.mxu0 %v869_v13  ;;  %635 = vmatprep.mubr.bf16.mxu1 %v337_v56  ;;  %v339_v61 = vpack.c.bf16 %v335_v60, %v335_v60  ;;  %v909_v0 = vld [vmem:[#allocation8 + $0x80] sm:$0xff]   ;;  %v334_v1 = vld [vmem:[#allocation7 + $0x10] sm:$0xff] }
  0x48   :  { %779 = vmatprep.subr.bf16.mxu0 %v871_v14  ;;  %798 = vmatpush3.bf16.msra.mxu1 %v881_v25  ;;  %v338_v2 = vpack.c.bf16 %v334_v1, %v334_v1  ;;  %v715_v8 = vld [vmem:[%s1122_s2] ss:$0 sm:$0xff] }
  0x49   :  { %799 = vmatprep.subr.bf16.mxu1 %v882_v28 }
  0x4b   :  { %780 = vmatpush3.bf16.msra.mxu0 %v872_v17 }
  0x4c   :  { %781 = vmatprep.subr.bf16.mxu0 %v874_v21  ;;  %800 = vmatpush3.bf16.msra.mxu1 %v884_v32 }
  0x4d   :  { %801 = vmatprep.subr.bf16.mxu1 %v886_v33 }
  0x4f   :  { %782 = vmatpush3.bf16.msra.mxu0 %v876_v23 }
  0x50   :  { %783 = vmatprep.subr.bf16.mxu0 %v878_v24  ;;  %802 = vmatpush3.bf16.msra.mxu1 %v888_v37 }
  0x51   :  { %803 = vmatprep.subr.bf16.mxu1 %v890_v38 }
  0x53   :  { %784 = vmatpush3.bf16.msra.mxu0 %v880_v29 }
  0x54   :  { %817 = vmatprep.subr.bf16.mxu0 %v883_v31  ;;  %804 = vmatpush3.bf16.msra.mxu1 %v892_v41 }
  0x55   :  { %805 = vmatprep.subr.bf16.mxu1 %v894_v42 }
  0x56   :  { %284 = vmatmul.mubr.bf16.vlgmr.msra.gmra.mxu0 %v82_v35 }
  0x57   :  { %818 = vmatpush3.bf16.msra.mxu0 %v885_v34  ;;  %675 = vmatprep.mubr.bf16.mxu0 %v339_v61 }
  0x58   :  { %819 = vmatprep.subr.bf16.mxu0 %v887_v36  ;;  %806 = vmatpush3.bf16.msra.mxu1 %v896_v45 }
  0x59   :  { %807 = vmatprep.subr.bf16.mxu1 %v898_v46 }
  0x5b   :  { %820 = vmatpush3.bf16.msra.mxu0 %v889_v39 }
  0x5c   :  { %821 = vmatprep.subr.bf16.mxu0 %v891_v40  ;;  %808 = vmatpush3.bf16.msra.mxu1 %v900_v49 }
  0x5d   :  { %809 = vmatprep.subr.bf16.mxu1 %v902_v50 }
  0x5f   :  { %822 = vmatpush3.bf16.msra.mxu0 %v893_v43 }
  0x60   :  { %823 = vmatprep.subr.bf16.mxu0 %v895_v44  ;;  %810 = vmatpush3.bf16.msra.mxu1 %v904_v53 }
  0x63   :  { %824 = vmatpush3.bf16.msra.mxu0 %v897_v47  ;;  %636 = vmatmul.mubr.bf16.vlgmr.msra.gmra.mxu1 %v336_v57 }
  0x64   :  { %825 = vmatprep.subr.bf16.mxu0 %v899_v48 }
  0x67   :  { %826 = vmatpush3.bf16.msra.mxu0 %v901_v51 }
  0x68   :  { %827 = vmatprep.subr.bf16.mxu0 %v903_v52 }
  0x6b   :  { %828 = vmatpush3.bf16.msra.mxu0 %v905_v58 }
  0x6c   :  { %829 = vmatprep.subr.bf16.mxu0 %v906_v59 }
  0x6f   :  { %830 = vmatpush3.bf16.msra.mxu0 %v907_v62 }
  0x70   :  { %831 = vmatprep.subr.bf16.mxu0 %v908_v63 }
  0x73   :  { %832 = vmatpush3.bf16.msra.mxu0 %v909_v0 }
  0x76   :  { %676 = vmatmul.mubr.bf16.vlgmr.msra.gmra.mxu0 %v338_v2 }
 0x103   :  { %v325_v3 = vpop.f32.mrf.mxu1 }
 0x105   :  { %v847_v4 = vpop.f32.mrf.mxu1 }
 0x107   :  { %v328_v5 = vpop.f32.mrf.mxu1 }
 0x109   :  { %v848_v6 = vpop.f32.mrf.mxu1 }
 0x116   :  { %v785_v7 = vpop.f32.mrf.mxu0 }
 0x118   :  { %v786_v9 = vpop.f32.mrf.mxu0 }
 0x119   :  { %v787_v10 = vadd.f32 %v786_v9, %v785_v7 }
 0x11a   :  { %v788_v11 = vpop.f32.mrf.mxu0 }
 0x11b   :  { %v286_v12 = vadd.f32 %v787_v10, %v715_v8 }
 0x11c   :  { %v789_v13 = vpop.f32.mrf.mxu0 }
 0x11d   :  { %v326_v14 = vadd.f32 %v325_v3, %v286_v12 }
 0x11f   :  { %331 = vst [vmem:[#allocation10] sm:$0xff] %v326_v14 }
 0x120   :  { %1001 = shalt.err (!%p998_p10)
}
 0x121   :  { %693 = dma.vmem_to_hbm [thread:$0]  %s691_s22, 128, %s1126_s6, [#allocation4]   ;;  %v736_v20 = vld [vmem:[%s1125_s5] ss:$0 sm:$0xff] }
 0x122   :  { %s1049_s27 = smov [#allocation11]  }
 0x123   :  { %v811_v15 = vpop.f32.mrf.mxu1  ;;  %s700_s28 = sshll.u32 %s1049_s27, 4  ;;  %s701_s28 = int_to_ptr.vmem [resolvable:$true] %s700_s28 }
 0x124   :  { %s1010_s6 = scalar_lea.vmem %s701_s28, 128  ;;  %p1015_p12 = scmp.lt.s32.totalorder %s701_s28, %s701_s28 }
 0x125   :  { %v812_v16 = vpop.f32.mrf.mxu1  ;;  %p1011_p11 = scmp.ne.s32.totalorder %s701_s28, %s1010_s6  ;;  %p1016_p13 = scmp.lt.s32.totalorder %s1010_s6, %s1010_s6 }
 0x126   :  { %v813_v19 = vadd.f32 %v812_v16, %v811_v15 }
 0x127   :  { %v814_v17 = vpop.f32.mrf.mxu1  ;;  %p1017_p0 = por %p1016_p13, %p1015_p12 }
 0x128   :  { %v638_v23 = vadd.f32 %v813_v19, %v736_v20 }
 0x129   :  { %v815_v18 = vpop.f32.mrf.mxu1  ;;  %p1018_p1 = pnand %p1017_p0, %p1011_p11 }
 0x136   :  { %v833_v21 = vpop.f32.mrf.mxu0 }
 0x138   :  { %v834_v22 = vpop.f32.mrf.mxu0 }
 0x139   :  { %v835_v24 = vadd.f32 %v834_v22, %v833_v21 }
 0x13a   :  { %v836_v25 = vpop.f32.mrf.mxu0 }
 0x13b   :  { %v678_v26 = vadd.f32 %v835_v24, %v638_v23 }
 0x13c   :  { %v837_v27 = vpop.f32.mrf.mxu0 }
 0x13d   :  { %683 = vst [vmem:[#allocation11] sm:$0xff] %v678_v26 }
 0x13e   :  { %1021 = shalt.err (!%p1018_p1)
}
 0x13f   :  { %703 = dma.vmem_to_hbm [thread:$0]  %s701_s28, 128, %s1127_s7, [#allocation12]  }
 0x140   :  { %1036 = dma.done.wait [#allocation4], 128  }
 0x141   :  { %1037 = vsyncadd [#allocation4], 4294967168 }
 0x142   :  { %1038 = dma.done.wait [#allocation12], 128  }
 0x143   :  { %1039 = vsyncadd [#allocation12], 4294967168 }
 0x144   :  { %710 = vsyncpa [#allocation3], 1 }
 0x145   :  { %711 = vsyncpa [#allocation6], 1 }
 0x146   :  { %712 = vsyncpa [#allocation9], 1 }
 0x147   :  { %713 = vsyncpa [#allocation4], 1 }
 0x148   :  { %714 = vsyncpa [#allocation12], 1 }

</bundles_post_ra>
